<compile_context>
chip_gen: v7x
topology: tpu7x:2x2x1
jax: 0.10.0
libtpu: 0.0.40
codegen_flags: <defaults>
</compile_context>

<pallas_src>
import functools

import jax
import jax.numpy as jnp
import numpy as np
from jax import lax
from jax.experimental import pallas as pl
from jax.experimental.pallas import tpu as pltpu


def _round_up(x, m):
    return (x + m - 1) // m * m


def _ceil_div(a, b):
    return -(-a // b)


def _tpu_info():
    try:
        return pltpu.get_tpu_info()
    except Exception:
        return None


def _vmem_capacity_bytes():
    info = _tpu_info()
    if info is not None:
        v = getattr(info, "vmem_capacity_bytes", None)
        if isinstance(v, int) and v > 0:
            return v
    return 64 << 20          # conservative default (v7x per-TensorCore)


def _num_tensorcores():
    info = _tpu_info()
    if info is not None:
        for name in ("num_cores", "core_count", "num_tensorcores",
                     "tensorcore_count", "cores_per_chip"):
            v = getattr(info, name, None)
            if isinstance(v, int) and v >= 1:
                return v
    return 1


def _kernel_vmem_bytes(chunk, Bb, Hp, Tp, in_bytes):
    """Estimated VMEM footprint of the kernel for a given time chunk."""
    xp = 2 * chunk * Bb * Hp * in_bytes      # streamed input, double-buffered
    out = 2 * chunk * Bb * Tp * 4            # streamed logits (f32), double-buffered
    weights = Hp * Hp * in_bytes + Hp * Tp * in_bytes + 8 * Tp * 4   # resident, 1 copy
    scratch = Bb * Hp * 4                    # recurrent carry
    return xp + out + weights + scratch


def rnn_tagger_kernel(xp_ref, whh_t_ref, wtag_t_ref, btag_ref, out_ref,
                      h_carry_ref, *, chunk, unroll):
    """One grid step == (one batch block, one time chunk).

    xp_ref     : (chunk, Bb, Hp)  precomputed x_t @ W_ih^T + (b_ih + b_hh)
    whh_t_ref  : (Hp, Hp)         W_hh^T   -- whole-array VMEM resident
    wtag_t_ref : (Hp, Tp)         W_tag^T  -- whole-array VMEM resident
    btag_ref   : (1, Tp)          b_tag    -- whole-array VMEM resident
    out_ref    : (chunk, Bb, Tp)  per-timestep tag logits
    h_carry_ref: (Bb, Hp)         recurrent state carried across time chunks
    """
    # Reset the recurrent state at the FIRST TIME CHUNK of every batch block.
    # Keyed on the time-axis program_id so the megacore batch split is correct.
    @pl.when(pl.program_id(1) == 0)
    def _():
        h_carry_ref[...] = jnp.zeros_like(h_carry_ref)

    whh_t = whh_t_ref[...]                          # (Hp, Hp)
    wtag_t = wtag_t_ref[...]                        # (Hp, Tp)
    # Hoist the bias broadcast out of the (unrolled) loop -- JAX does not CSE
    # broadcast_in_dim.
    btag = jnp.broadcast_to(btag_ref[...].astype(jnp.float32), out_ref.shape[1:])

    def step(i, h_prev):
        # xp_ref[i] / out_ref[i] are full, aligned tiles -> unmasked vld/vst.
        # Matmuls run in the (possibly bf16) compute dtype with f32 accumulate;
        # the add + tanh path and the carried state stay f32 (v5e-friendly).
        pre = xp_ref[i].astype(jnp.float32) + jnp.dot(
            h_prev.astype(whh_t.dtype), whh_t,
            preferred_element_type=jnp.float32)
        h_new = jnp.tanh(pre)                                      # (Bb, Hp) f32
        out_ref[i] = (jnp.dot(h_new.astype(wtag_t.dtype), wtag_t,
                              preferred_element_type=jnp.float32)
                      + btag).astype(out_ref.dtype)
        return h_new

    # Short fixed trip count; unroll capped for large batch tiles to avoid
    # vreg spills landing on the serial critical path.
    h_carry_ref[...] = lax.fori_loop(0, chunk, step, h_carry_ref[...],
                                     unroll=unroll)


def rnn_tagger_forward(sentence, params, *, max_chunk=32,
                       compute_dtype=jnp.float32, batch_blocks=None):
    """sentence: (batch, seq, embedding_dim) f32 -> (batch, seq, tagset_size)."""
    w_ih, w_hh, b_ih, b_hh, w_tag, b_tag = params
    B, S, E = sentence.shape
    H = w_hh.shape[0]
    T = w_tag.shape[0]

    # Megacore: split the (independent) batch rows across TensorCores when
    # available (v7x has 2).  Harmless no-op structure on 1-TC chips.
    if batch_blocks is None:
        n_cores = _num_tensorcores()
        batch_blocks = n_cores if (n_cores > 1 and B > 8) else 1
    batch_blocks = max(1, int(batch_blocks))

    Bp = _round_up(max(B, 1), 8 * batch_blocks)   # sublane axis, per-block mult of 8
    Bb = Bp // batch_blocks
    Hp = _round_up(H, 128)                        # lane axis
    Tp = _round_up(T, 128)

    in_bytes = jnp.dtype(compute_dtype).itemsize

    # Time-chunk selection under an explicit per-generation VMEM budget.
    # S is padded up to a multiple of the chunk so awkward (e.g. prime)
    # sequence lengths never degenerate to chunk == 1.
    vmem_cap = _vmem_capacity_bytes()
    budget = int(0.6 * vmem_cap)
    mc = max(1, min(max_chunk, S))
    while True:
        n_chunks = _ceil_div(S, mc)
        chunk = _ceil_div(S, n_chunks)
        need = _kernel_vmem_bytes(chunk, Bb, Hp, Tp, in_bytes)
        if need <= budget or chunk == 1:
            break
        mc = max(1, mc // 2)
    Sp = chunk * n_chunks

    # ---- hoisted, parallel-over-time input projection (one big matmul) ------
    # pre[b, s, :] = x[b, s] @ W_ih^T + (b_ih + b_hh)
    pre = jnp.dot(sentence, w_ih.T,
                  preferred_element_type=jnp.float32) + (b_ih + b_hh)    # (B,S,H)

    # Time-major + zero-pad to hardware tiles; cast matmul operands to the
    # compute dtype (bf16 halves the streamed DMA and the resident weights).
    # Padded batch rows / hidden lanes / trailing timesteps stay exactly zero
    # (or are trimmed) so the result is unchanged.
    xp = jnp.pad(jnp.swapaxes(pre, 0, 1),
                 ((0, Sp - S), (0, Bp - B), (0, Hp - H))).astype(compute_dtype)
    whh_t = jnp.pad(w_hh.T, ((0, Hp - H), (0, Hp - H))).astype(compute_dtype)
    wtag_t = jnp.pad(w_tag.T, ((0, Hp - H), (0, Tp - T))).astype(compute_dtype)
    btag = jnp.pad(b_tag, (0, Tp - T)).astype(jnp.float32).reshape(1, Tp)

    unroll = chunk if Bb <= 64 else max(1, min(chunk, 8))   # vreg-pressure guard
    vmem_limit = int(min(max(2 * need, 32 << 20), int(0.75 * vmem_cap)))
    vmem_limit = max(vmem_limit, need + (2 << 20))

    logits_pad = pl.pallas_call(
        functools.partial(rnn_tagger_kernel, chunk=chunk, unroll=unroll),
        out_shape=jax.ShapeDtypeStruct((Sp, Bp, Tp), jnp.float32),
        grid_spec=pltpu.PrefetchScalarGridSpec(
            num_scalar_prefetch=0,
            grid=(batch_blocks, n_chunks),
            in_specs=[
                # Streamed activation chunks (double-buffered by the pipeline).
                pl.BlockSpec((chunk, Bb, Hp), lambda b, c: (c, b, 0)),
                # Weights / bias: whole-array VMEM residents -> DMA'd once,
                # NOT double-buffered (half the VMEM vs a constant-index BlockSpec).
                pl.BlockSpec(memory_space=pltpu.MemorySpace.VMEM),
                pl.BlockSpec(memory_space=pltpu.MemorySpace.VMEM),
                pl.BlockSpec(memory_space=pltpu.MemorySpace.VMEM),
            ],
            out_specs=pl.BlockSpec((chunk, Bb, Tp), lambda b, c: (c, b, 0)),
            scratch_shapes=[pltpu.VMEM((Bb, Hp), jnp.float32)],   # h carry
        ),
        compiler_params=pltpu.CompilerParams(
            # Batch blocks are independent -> "parallel" (megacore split on v7x);
            # the time-chunk axis carries the recurrence -> "arbitrary".
            dimension_semantics=("parallel", "arbitrary"),
            vmem_limit_bytes=vmem_limit),
    )(xp, whh_t, wtag_t, btag)

    # Trim time/batch/tag padding; return batch-major logits (B, S, T).
    return jnp.transpose(logits_pad[:S, :B, :T], (1, 0, 2))


def rnn_tagger_reference(sentence, params):
    """Pure-JAX reference matching nn.RNN(tanh, batch_first) + nn.Linear."""
    w_ih, w_hh, b_ih, b_hh, w_tag, b_tag = params
    B, S, E = sentence.shape
    H = w_hh.shape[0]

    def step(h, x_t):
        h_new = jnp.tanh(x_t @ w_ih.T + b_ih + h @ w_hh.T + b_hh)
        return h_new, h_new

    h0 = jnp.zeros((B, H), jnp.float32)
    _, hs = lax.scan(step, h0, jnp.transpose(sentence, (1, 0, 2)))   # (S, B, H)
    hidden = jnp.transpose(hs, (1, 0, 2))                            # (B, S, H)
    return hidden @ w_tag.T + b_tag


def init_params(key, embedding_dim, hidden_dim, tagset_size):
    """Deterministic init mimicking PyTorch's U(-1/sqrt(H), 1/sqrt(H)) scheme."""
    ks = jax.random.split(key, 6)
    bound = 1.0 / np.sqrt(hidden_dim)
    w_ih = jax.random.uniform(ks[0], (hidden_dim, embedding_dim), jnp.float32, -bound, bound)
    w_hh = jax.random.uniform(ks[1], (hidden_dim, hidden_dim), jnp.float32, -bound, bound)
    b_ih = jax.random.uniform(ks[2], (hidden_dim,), jnp.float32, -bound, bound)
    b_hh = jax.random.uniform(ks[3], (hidden_dim,), jnp.float32, -bound, bound)
    w_tag = jax.random.uniform(ks[4], (tagset_size, hidden_dim), jnp.float32, -bound, bound)
    b_tag = jax.random.uniform(ks[5], (tagset_size,), jnp.float32, -bound, bound)
    return (w_ih, w_hh, b_ih, b_hh, w_tag, b_tag)


if __name__ == "__main__":
    # Small shapes consistent with the module: batch=2, seq=8, emb=16, hidden=32, tags=8
    B, S, E, H, T = 2, 8, 16, 32, 8

    key = jax.random.PRNGKey(0)
    k_x, k_p = jax.random.split(key)
    sentence = jax.random.normal(k_x, (B, S, E), jnp.float32)
    params = init_params(k_p, E, H, T)

    ref = jax.block_until_ready(rnn_tagger_reference(sentence, params))

    # 1) Default f32 path.
    out = jax.block_until_ready(rnn_tagger_forward(sentence, params))
    assert out.shape == (B, S, T), out.shape
    np.testing.assert_allclose(np.asarray(out), np.asarray(ref), rtol=1e-5, atol=1e-5)

    # 2) Explicit 2-way batch-block split (megacore-style grid) -- still exact f32.
    out2 = jax.block_until_ready(
        rnn_tagger_forward(sentence, params, batch_blocks=2))
    np.testing.assert_allclose(np.asarray(out2), np.asarray(ref), rtol=1e-5, atol=1e-5)

    # 3) bf16 matmul operands (f32 carry / add / tanh) -- looser tolerance.
    out_bf16 = jax.block_until_ready(
        rnn_tagger_forward(sentence, params, compute_dtype=jnp.bfloat16))
    np.testing.assert_allclose(np.asarray(out_bf16), np.asarray(ref),
                               rtol=5e-2, atol=5e-2)

    print("KERNEL_OK")
</pallas_src>

<mosaic_0001>
module attributes {stable_mosaic.version = 11 : i64} {
  func.func @rnn_tagger_kernel(%arg0: i32, %arg1: i32, %arg2: memref<8x8x128xf32, #tpu.memory_space<vmem>>, %arg3: memref<128x128xf32, #tpu.memory_space<vmem>>, %arg4: memref<128x128xf32, #tpu.memory_space<vmem>>, %arg5: memref<1x128xf32, #tpu.memory_space<vmem>>, %arg6: memref<8x8x128xf32, #tpu.memory_space<vmem>>, %arg7: memref<8x128xf32, #tpu.memory_space<vmem>>) attributes {dimension_semantics = [#tpu.dimension_semantics<parallel>, #tpu.dimension_semantics<arbitrary>], iteration_bounds = array<i64: 1, 1>, scalar_prefetch = 0 : i64, scratch_operands = 1 : i64, tpu.core_type = #tpu.core_type<tc>, window_params = [{transform_indices = @transform_0, window_bounds = array<i64: 8, 8, 128>}, {pipeline_mode = #tpu.pipeline_mode<synchronous>, transform_indices = @transform_1, window_bounds = array<i64: 128, 128>}, {pipeline_mode = #tpu.pipeline_mode<synchronous>, transform_indices = @transform_2, window_bounds = array<i64: 128, 128>}, {pipeline_mode = #tpu.pipeline_mode<synchronous>, transform_indices = @transform_3, window_bounds = array<i64: 1, 128>}, {transform_indices = @transform_4, window_bounds = array<i64: 8, 8, 128>}]} {
    %c0_i32 = arith.constant 0 : i32
    %0 = arith.cmpi eq, %arg1, %c0_i32 : i32
    %1 = arith.extui %0 : i1 to i32
    %c0_i32_0 = arith.constant 0 : i32
    %2 = arith.cmpi ne, %1, %c0_i32_0 : i32
    scf.if %2 {
      %cst_58 = arith.constant 0.000000e+00 : f32
      %106 = vector.broadcast %cst_58 : f32 to vector<8x128xf32>
      %c0_59 = arith.constant 0 : index
      %c0_60 = arith.constant 0 : index
      %107 = vector.load %arg7[%c0_59, %c0_60] : memref<8x128xf32, #tpu.memory_space<vmem>>, vector<8x128xf32>
      tpu.vector_store %arg7[%c0_59, %c0_60], %106 {strides = array<i32>} : memref<8x128xf32, #tpu.memory_space<vmem>>, vector<8x128xf32>,
    } else {
    }
    %c0 = arith.constant 0 : index
    %c0_1 = arith.constant 0 : index
    %3 = vector.load %arg3[%c0, %c0_1] : memref<128x128xf32, #tpu.memory_space<vmem>>, vector<128x128xf32>
    %c0_2 = arith.constant 0 : index
    %c0_3 = arith.constant 0 : index
    %4 = vector.load %arg4[%c0_2, %c0_3] : memref<128x128xf32, #tpu.memory_space<vmem>>, vector<128x128xf32>
    %c0_4 = arith.constant 0 : index
    %c0_5 = arith.constant 0 : index
    %5 = vector.load %arg5[%c0_4, %c0_5] : memref<1x128xf32, #tpu.memory_space<vmem>>, vector<1x128xf32>
    %6 = vector.shape_cast %5 : vector<1x128xf32> to vector<1x128xf32>
    %7 = vector.broadcast %6 : vector<1x128xf32> to vector<8x128xf32>
    %c0_6 = arith.constant 0 : index
    %c0_7 = arith.constant 0 : index
    %8 = vector.load %arg7[%c0_6, %c0_7] : memref<8x128xf32, #tpu.memory_space<vmem>>, vector<8x128xf32>
    %c0_i32_8 = arith.constant 0 : i32
    %9 = arith.index_cast %c0_i32_8 : i32 to index
    %c0_9 = arith.constant 0 : index
    %c0_10 = arith.constant 0 : index
    %10 = vector.load %arg2[%9, %c0_9, %c0_10] : memref<8x8x128xf32, #tpu.memory_space<vmem>>, vector<1x8x128xf32>
    %11 = vector.shape_cast %10 : vector<1x8x128xf32> to vector<8x128xf32>
    %cst = arith.constant dense<0.000000e+00> : vector<8x128xf32>
    %12 = tpu.matmul %8, %3, %cst {dimension_numbers = #tpu.dot_dimension_numbers<[1], [0], [0], [1], [0, 0, 1, 1], [], []>} : vector<8x128xf32>, vector<128x128xf32>, vector<8x128xf32> -> vector<8x128xf32>
    %13 = arith.addf %11, %12 : vector<8x128xf32>
    %14 = math.tanh %13 : vector<8x128xf32>
    %cst_11 = arith.constant dense<0.000000e+00> : vector<8x128xf32>
    %15 = tpu.matmul %14, %4, %cst_11 {dimension_numbers = #tpu.dot_dimension_numbers<[1], [0], [0], [1], [0, 0, 1, 1], [], []>} : vector<8x128xf32>, vector<128x128xf32>, vector<8x128xf32> -> vector<8x128xf32>
    %16 = arith.addf %15, %7 : vector<8x128xf32>
    %17 = arith.index_cast %c0_i32_8 : i32 to index
    %c0_12 = arith.constant 0 : index
    %c0_13 = arith.constant 0 : index
    %18 = vector.load %arg6[%17, %c0_12, %c0_13] : memref<8x8x128xf32, #tpu.memory_space<vmem>>, vector<1x8x128xf32>
    %19 = vector.shape_cast %18 : vector<1x8x128xf32> to vector<8x128xf32>
    %20 = vector.shape_cast %16 : vector<8x128xf32> to vector<1x8x128xf32>
    tpu.vector_store %arg6[%17, %c0_12, %c0_13], %20 {strides = array<i32>} : memref<8x8x128xf32, #tpu.memory_space<vmem>>, vector<1x8x128xf32>,
    %c1_i32 = arith.constant 1 : i32
    %21 = arith.index_cast %c1_i32 : i32 to index
    %c0_14 = arith.constant 0 : index
    %c0_15 = arith.constant 0 : index
    %22 = vector.load %arg2[%21, %c0_14, %c0_15] : memref<8x8x128xf32, #tpu.memory_space<vmem>>, vector<1x8x128xf32>
    %23 = vector.shape_cast %22 : vector<1x8x128xf32> to vector<8x128xf32>
    %cst_16 = arith.constant dense<0.000000e+00> : vector<8x128xf32>
    %24 = tpu.matmul %14, %3, %cst_16 {dimension_numbers = #tpu.dot_dimension_numbers<[1], [0], [0], [1], [0, 0, 1, 1], [], []>} : vector<8x128xf32>, vector<128x128xf32>, vector<8x128xf32> -> vector<8x128xf32>
    %25 = arith.addf %23, %24 : vector<8x128xf32>
    %26 = math.tanh %25 : vector<8x128xf32>
    %cst_17 = arith.constant dense<0.000000e+00> : vector<8x128xf32>
    %27 = tpu.matmul %26, %4, %cst_17 {dimension_numbers = #tpu.dot_dimension_numbers<[1], [0], [0], [1], [0, 0, 1, 1], [], []>} : vector<8x128xf32>, vector<128x128xf32>, vector<8x128xf32> -> vector<8x128xf32>
    %28 = arith.addf %27, %7 : vector<8x128xf32>
    %29 = arith.index_cast %c1_i32 : i32 to index
    %c0_18 = arith.constant 0 : index
    %c0_19 = arith.constant 0 : index
    %30 = vector.load %arg6[%29, %c0_18, %c0_19] : memref<8x8x128xf32, #tpu.memory_space<vmem>>, vector<1x8x128xf32>
    %31 = vector.shape_cast %30 : vector<1x8x128xf32> to vector<8x128xf32>
    %32 = vector.shape_cast %28 : vector<8x128xf32> to vector<1x8x128xf32>
    tpu.vector_store %arg6[%29, %c0_18, %c0_19], %32 {strides = array<i32>} : memref<8x8x128xf32, #tpu.memory_space<vmem>>, vector<1x8x128xf32>,
    %c2_i32 = arith.constant 2 : i32
    %33 = arith.index_cast %c2_i32 : i32 to index
    %c0_20 = arith.constant 0 : index
    %c0_21 = arith.constant 0 : index
    %34 = vector.load %arg2[%33, %c0_20, %c0_21] : memref<8x8x128xf32, #tpu.memory_space<vmem>>, vector<1x8x128xf32>
    %35 = vector.shape_cast %34 : vector<1x8x128xf32> to vector<8x128xf32>
    %cst_22 = arith.constant dense<0.000000e+00> : vector<8x128xf32>
    %36 = tpu.matmul %26, %3, %cst_22 {dimension_numbers = #tpu.dot_dimension_numbers<[1], [0], [0], [1], [0, 0, 1, 1], [], []>} : vector<8x128xf32>, vector<128x128xf32>, vector<8x128xf32> -> vector<8x128xf32>
    %37 = arith.addf %35, %36 : vector<8x128xf32>
    %38 = math.tanh %37 : vector<8x128xf32>
    %cst_23 = arith.constant dense<0.000000e+00> : vector<8x128xf32>
    %39 = tpu.matmul %38, %4, %cst_23 {dimension_numbers = #tpu.dot_dimension_numbers<[1], [0], [0], [1], [0, 0, 1, 1], [], []>} : vector<8x128xf32>, vector<128x128xf32>, vector<8x128xf32> -> vector<8x128xf32>
    %40 = arith.addf %39, %7 : vector<8x128xf32>
    %41 = arith.index_cast %c2_i32 : i32 to index
    %c0_24 = arith.constant 0 : index
    %c0_25 = arith.constant 0 : index
    %42 = vector.load %arg6[%41, %c0_24, %c0_25] : memref<8x8x128xf32, #tpu.memory_space<vmem>>, vector<1x8x128xf32>
    %43 = vector.shape_cast %42 : vector<1x8x128xf32> to vector<8x128xf32>
    %44 = vector.shape_cast %40 : vector<8x128xf32> to vector<1x8x128xf32>
    tpu.vector_store %arg6[%41, %c0_24, %c0_25], %44 {strides = array<i32>} : memref<8x8x128xf32, #tpu.memory_space<vmem>>, vector<1x8x128xf32>,
    %c3_i32 = arith.constant 3 : i32
    %45 = arith.index_cast %c3_i32 : i32 to index
    %c0_26 = arith.constant 0 : index
    %c0_27 = arith.constant 0 : index
    %46 = vector.load %arg2[%45, %c0_26, %c0_27] : memref<8x8x128xf32, #tpu.memory_space<vmem>>, vector<1x8x128xf32>
    %47 = vector.shape_cast %46 : vector<1x8x128xf32> to vector<8x128xf32>
    %cst_28 = arith.constant dense<0.000000e+00> : vector<8x128xf32>
    %48 = tpu.matmul %38, %3, %cst_28 {dimension_numbers = #tpu.dot_dimension_numbers<[1], [0], [0], [1], [0, 0, 1, 1], [], []>} : vector<8x128xf32>, vector<128x128xf32>, vector<8x128xf32> -> vector<8x128xf32>
    %49 = arith.addf %47, %48 : vector<8x128xf32>
    %50 = math.tanh %49 : vector<8x128xf32>
    %cst_29 = arith.constant dense<0.000000e+00> : vector<8x128xf32>
    %51 = tpu.matmul %50, %4, %cst_29 {dimension_numbers = #tpu.dot_dimension_numbers<[1], [0], [0], [1], [0, 0, 1, 1], [], []>} : vector<8x128xf32>, vector<128x128xf32>, vector<8x128xf32> -> vector<8x128xf32>
    %52 = arith.addf %51, %7 : vector<8x128xf32>
    %53 = arith.index_cast %c3_i32 : i32 to index
    %c0_30 = arith.constant 0 : index
    %c0_31 = arith.constant 0 : index
    %54 = vector.load %arg6[%53, %c0_30, %c0_31] : memref<8x8x128xf32, #tpu.memory_space<vmem>>, vector<1x8x128xf32>
    %55 = vector.shape_cast %54 : vector<1x8x128xf32> to vector<8x128xf32>
    %56 = vector.shape_cast %52 : vector<8x128xf32> to vector<1x8x128xf32>
    tpu.vector_store %arg6[%53, %c0_30, %c0_31], %56 {strides = array<i32>} : memref<8x8x128xf32, #tpu.memory_space<vmem>>, vector<1x8x128xf32>,
    %c4_i32 = arith.constant 4 : i32
    %57 = arith.index_cast %c4_i32 : i32 to index
    %c0_32 = arith.constant 0 : index
    %c0_33 = arith.constant 0 : index
    %58 = vector.load %arg2[%57, %c0_32, %c0_33] : memref<8x8x128xf32, #tpu.memory_space<vmem>>, vector<1x8x128xf32>
    %59 = vector.shape_cast %58 : vector<1x8x128xf32> to vector<8x128xf32>
    %cst_34 = arith.constant dense<0.000000e+00> : vector<8x128xf32>
    %60 = tpu.matmul %50, %3, %cst_34 {dimension_numbers = #tpu.dot_dimension_numbers<[1], [0], [0], [1], [0, 0, 1, 1], [], []>} : vector<8x128xf32>, vector<128x128xf32>, vector<8x128xf32> -> vector<8x128xf32>
    %61 = arith.addf %59, %60 : vector<8x128xf32>
    %62 = math.tanh %61 : vector<8x128xf32>
    %cst_35 = arith.constant dense<0.000000e+00> : vector<8x128xf32>
    %63 = tpu.matmul %62, %4, %cst_35 {dimension_numbers = #tpu.dot_dimension_numbers<[1], [0], [0], [1], [0, 0, 1, 1], [], []>} : vector<8x128xf32>, vector<128x128xf32>, vector<8x128xf32> -> vector<8x128xf32>
    %64 = arith.addf %63, %7 : vector<8x128xf32>
    %65 = arith.index_cast %c4_i32 : i32 to index
    %c0_36 = arith.constant 0 : index
    %c0_37 = arith.constant 0 : index
    %66 = vector.load %arg6[%65, %c0_36, %c0_37] : memref<8x8x128xf32, #tpu.memory_space<vmem>>, vector<1x8x128xf32>
    %67 = vector.shape_cast %66 : vector<1x8x128xf32> to vector<8x128xf32>
    %68 = vector.shape_cast %64 : vector<8x128xf32> to vector<1x8x128xf32>
    tpu.vector_store %arg6[%65, %c0_36, %c0_37], %68 {strides = array<i32>} : memref<8x8x128xf32, #tpu.memory_space<vmem>>, vector<1x8x128xf32>,
    %c5_i32 = arith.constant 5 : i32
    %69 = arith.index_cast %c5_i32 : i32 to index
    %c0_38 = arith.constant 0 : index
    %c0_39 = arith.constant 0 : index
    %70 = vector.load %arg2[%69, %c0_38, %c0_39] : memref<8x8x128xf32, #tpu.memory_space<vmem>>, vector<1x8x128xf32>
    %71 = vector.shape_cast %70 : vector<1x8x128xf32> to vector<8x128xf32>
    %cst_40 = arith.constant dense<0.000000e+00> : vector<8x128xf32>
    %72 = tpu.matmul %62, %3, %cst_40 {dimension_numbers = #tpu.dot_dimension_numbers<[1], [0], [0], [1], [0, 0, 1, 1], [], []>} : vector<8x128xf32>, vector<128x128xf32>, vector<8x128xf32> -> vector<8x128xf32>
    %73 = arith.addf %71, %72 : vector<8x128xf32>
    %74 = math.tanh %73 : vector<8x128xf32>
    %cst_41 = arith.constant dense<0.000000e+00> : vector<8x128xf32>
    %75 = tpu.matmul %74, %4, %cst_41 {dimension_numbers = #tpu.dot_dimension_numbers<[1], [0], [0], [1], [0, 0, 1, 1], [], []>} : vector<8x128xf32>, vector<128x128xf32>, vector<8x128xf32> -> vector<8x128xf32>
    %76 = arith.addf %75, %7 : vector<8x128xf32>
    %77 = arith.index_cast %c5_i32 : i32 to index
    %c0_42 = arith.constant 0 : index
    %c0_43 = arith.constant 0 : index
    %78 = vector.load %arg6[%77, %c0_42, %c0_43] : memref<8x8x128xf32, #tpu.memory_space<vmem>>, vector<1x8x128xf32>
    %79 = vector.shape_cast %78 : vector<1x8x128xf32> to vector<8x128xf32>
    %80 = vector.shape_cast %76 : vector<8x128xf32> to vector<1x8x128xf32>
    tpu.vector_store %arg6[%77, %c0_42, %c0_43], %80 {strides = array<i32>} : memref<8x8x128xf32, #tpu.memory_space<vmem>>, vector<1x8x128xf32>,
    %c6_i32 = arith.constant 6 : i32
    %81 = arith.index_cast %c6_i32 : i32 to index
    %c0_44 = arith.constant 0 : index
    %c0_45 = arith.constant 0 : index
    %82 = vector.load %arg2[%81, %c0_44, %c0_45] : memref<8x8x128xf32, #tpu.memory_space<vmem>>, vector<1x8x128xf32>
    %83 = vector.shape_cast %82 : vector<1x8x128xf32> to vector<8x128xf32>
    %cst_46 = arith.constant dense<0.000000e+00> : vector<8x128xf32>
    %84 = tpu.matmul %74, %3, %cst_46 {dimension_numbers = #tpu.dot_dimension_numbers<[1], [0], [0], [1], [0, 0, 1, 1], [], []>} : vector<8x128xf32>, vector<128x128xf32>, vector<8x128xf32> -> vector<8x128xf32>
    %85 = arith.addf %83, %84 : vector<8x128xf32>
    %86 = math.tanh %85 : vector<8x128xf32>
    %cst_47 = arith.constant dense<0.000000e+00> : vector<8x128xf32>
    %87 = tpu.matmul %86, %4, %cst_47 {dimension_numbers = #tpu.dot_dimension_numbers<[1], [0], [0], [1], [0, 0, 1, 1], [], []>} : vector<8x128xf32>, vector<128x128xf32>, vector<8x128xf32> -> vector<8x128xf32>
    %88 = arith.addf %87, %7 : vector<8x128xf32>
    %89 = arith.index_cast %c6_i32 : i32 to index
    %c0_48 = arith.constant 0 : index
    %c0_49 = arith.constant 0 : index
    %90 = vector.load %arg6[%89, %c0_48, %c0_49] : memref<8x8x128xf32, #tpu.memory_space<vmem>>, vector<1x8x128xf32>
    %91 = vector.shape_cast %90 : vector<1x8x128xf32> to vector<8x128xf32>
    %92 = vector.shape_cast %88 : vector<8x128xf32> to vector<1x8x128xf32>
    tpu.vector_store %arg6[%89, %c0_48, %c0_49], %92 {strides = array<i32>} : memref<8x8x128xf32, #tpu.memory_space<vmem>>, vector<1x8x128xf32>,
    %c7_i32 = arith.constant 7 : i32
    %93 = arith.index_cast %c7_i32 : i32 to index
    %c0_50 = arith.constant 0 : index
    %c0_51 = arith.constant 0 : index
    %94 = vector.load %arg2[%93, %c0_50, %c0_51] : memref<8x8x128xf32, #tpu.memory_space<vmem>>, vector<1x8x128xf32>
    %95 = vector.shape_cast %94 : vector<1x8x128xf32> to vector<8x128xf32>
    %cst_52 = arith.constant dense<0.000000e+00> : vector<8x128xf32>
    %96 = tpu.matmul %86, %3, %cst_52 {dimension_numbers = #tpu.dot_dimension_numbers<[1], [0], [0], [1], [0, 0, 1, 1], [], []>} : vector<8x128xf32>, vector<128x128xf32>, vector<8x128xf32> -> vector<8x128xf32>
    %97 = arith.addf %95, %96 : vector<8x128xf32>
    %98 = math.tanh %97 : vector<8x128xf32>
    %cst_53 = arith.constant dense<0.000000e+00> : vector<8x128xf32>
    %99 = tpu.matmul %98, %4, %cst_53 {dimension_numbers = #tpu.dot_dimension_numbers<[1], [0], [0], [1], [0, 0, 1, 1], [], []>} : vector<8x128xf32>, vector<128x128xf32>, vector<8x128xf32> -> vector<8x128xf32>
    %100 = arith.addf %99, %7 : vector<8x128xf32>
    %101 = arith.index_cast %c7_i32 : i32 to index
    %c0_54 = arith.constant 0 : index
    %c0_55 = arith.constant 0 : index
    %102 = vector.load %arg6[%101, %c0_54, %c0_55] : memref<8x8x128xf32, #tpu.memory_space<vmem>>, vector<1x8x128xf32>
    %103 = vector.shape_cast %102 : vector<1x8x128xf32> to vector<8x128xf32>
    %104 = vector.shape_cast %100 : vector<8x128xf32> to vector<1x8x128xf32>
    tpu.vector_store %arg6[%101, %c0_54, %c0_55], %104 {strides = array<i32>} : memref<8x8x128xf32, #tpu.memory_space<vmem>>, vector<1x8x128xf32>,
    %c8_i32 = arith.constant 8 : i32
    %c0_56 = arith.constant 0 : index
    %c0_57 = arith.constant 0 : index
    %105 = vector.load %arg7[%c0_56, %c0_57] : memref<8x128xf32, #tpu.memory_space<vmem>>, vector<8x128xf32>
    tpu.vector_store %arg7[%c0_56, %c0_57], %98 {strides = array<i32>} : memref<8x128xf32, #tpu.memory_space<vmem>>, vector<8x128xf32>,
    return
  }
  func.func @transform_0(%arg0: i32, %arg1: i32) -> (i32, i32, i32) {
    %c0_i32 = arith.constant 0 : i32
    %c0_i32_0 = arith.constant 0 : i32
    return %arg1, %arg0, %c0_i32 : i32, i32, i32
  }
  func.func @transform_1(%arg0: i32, %arg1: i32) -> (i32, i32) {
    %c0_i32 = arith.constant 0 : i32
    %c0_i32_0 = arith.constant 0 : i32
    %c0_i32_1 = arith.constant 0 : i32
    return %c0_i32, %c0_i32_0 : i32, i32
  }
  func.func @transform_2(%arg0: i32, %arg1: i32) -> (i32, i32) {
    %c0_i32 = arith.constant 0 : i32
    %c0_i32_0 = arith.constant 0 : i32
    %c0_i32_1 = arith.constant 0 : i32
    return %c0_i32, %c0_i32_0 : i32, i32
  }
  func.func @transform_3(%arg0: i32, %arg1: i32) -> (i32, i32) {
    %c0_i32 = arith.constant 0 : i32
    %c0_i32_0 = arith.constant 0 : i32
    %c0_i32_1 = arith.constant 0 : i32
    return %c0_i32, %c0_i32_0 : i32, i32
  }
  func.func @transform_4(%arg0: i32, %arg1: i32) -> (i32, i32, i32) {
    %c0_i32 = arith.constant 0 : i32
    %c0_i32_0 = arith.constant 0 : i32
    return %arg1, %arg0, %c0_i32 : i32, i32, i32
  }
}

</mosaic_0001>

<bundles_post_ra>
// kernel: tpu_custom_call.1
= control target key start
LH: loop header
LB: loop body
LE: loop exit
PB: predicated region body
PF: predicated region fallthrough
CT: control target
= control target key end

     0   :  { %9 = vsyncpa [#allocation4], 0  ;;  %s3060_s0 = inlined_call_operand.hbm [shape: f32[8,8,128], index: 0, kind: input, shape index: {}]   ;;  %s3061_s1 = inlined_call_operand.hbm [shape: f32[128,128], index: 1, kind: input, shape index: {}]   ;;  %s3062_s2 = inlined_call_operand.hbm [shape: f32[128,128], index: 2, kind: input, shape index: {}]   ;;  %s3063_s3 = inlined_call_operand.vmem [shape: f32[1,128], index: 3, kind: input, shape index: {}]   ;;  %s3064_s4 = inlined_call_operand.hbm [shape: f32[8,8,128], index: 4, kind: output, shape index: {}]  }
   0x1   :  { %10 = vsyncpa [#allocation7], 0 }
   0x2   :  { %11 = vsyncpa [#allocation5], 0  ;;  %s2625_s15 = smov [#allocation6]   ;;  %s2626_s17 = smov [#allocation3]  }
   0x3   :  { %s29_s16 = sshll.u32 %s2625_s15, 4  ;;  %s17_s18 = sshll.u32 %s2626_s17, 4  ;;  %s30_s16 = int_to_ptr.vmem [resolvable:$true] %s29_s16  ;;  %s2659_s18 = int_to_ptr.vmem [resolvable:$true] %s17_s18 }
   0x4   :  { %s2531_s21 = scalar_lea.hbm %s3061_s1, 2048 }
   0x5   :  { %p2532_p0 = scmp.ne.s32.totalorder %s3061_s1, %s2531_s21  ;;  %p2535_p1 = scmp.lt.u32.totalorder %s2531_s21, %s3061_s1 }
   0x7   :  { %p2537_p2 = pnand %p2535_p1, %p2532_p0 }
   0x9   :  { %2540 = shalt.err (!%p2537_p2)
}
   0xa   :  { %s2541_s26 = scalar_lea.vmem %s30_s16, 2048  ;;  %p2546_p4 = scmp.lt.s32.totalorder %s30_s16, %s30_s16 }
   0xb   :  { %p2542_p3 = scmp.ne.s32.totalorder %s30_s16, %s2541_s26  ;;  %p2547_p5 = scmp.lt.s32.totalorder %s2541_s26, %s2541_s26 }
   0xd   :  { %p2548_p6 = por %p2547_p5, %p2546_p4 }
   0xf   :  { %p2549_p7 = pnand %p2548_p6, %p2542_p3 }
  0x11   :  { %2552 = shalt.err (!%p2549_p7)
}
  0x12   :  { %s2627_s27 = smov 128   ;;  %s2628_s28 = smov 8  }
  0x13   :  { %35 = dma.hbm_to_vmem [thread:$0]  %s3061_s1, 2048, %s30_s16, [#allocation7], %s2627_s27, %s2627_s27, %s2628_s28  }
  0x14   :  { %s2553_s7 = scalar_lea.hbm %s3060_s0, 1024 }
  0x15   :  { %p2554_p8 = scmp.ne.s32.totalorder %s3060_s0, %s2553_s7  ;;  %p2557_p9 = scmp.lt.u32.totalorder %s2553_s7, %s3060_s0 }
  0x17   :  { %p2559_p10 = pnand %p2557_p9, %p2554_p8 }
  0x19   :  { %2562 = shalt.err (!%p2559_p10)
}
  0x1a   :  { %s2563_s12 = scalar_lea.vmem %s2659_s18, 1024  ;;  %p2568_p12 = scmp.lt.s32.totalorder %s2659_s18, %s2659_s18 }
  0x1b   :  { %p2564_p11 = scmp.ne.s32.totalorder %s2659_s18, %s2563_s12  ;;  %p2569_p13 = scmp.lt.s32.totalorder %s2563_s12, %s2563_s12 }
  0x1d   :  { %p2570_p0 = por %p2569_p13, %p2568_p12 }
  0x1f   :  { %p2571_p1 = pnand %p2570_p0, %p2564_p11 }
  0x21   :  { %2574 = shalt.err (!%p2571_p1)
}
  0x22   :  { %23 = dma.hbm_to_vmem [thread:$0]  %s3060_s0, 1024, %s2659_s18, [#allocation4], %s2627_s27, %s2627_s27, %s2628_s28  }
  0x23   :  { %s2629_s14 = smov [#allocation8]   ;;  %s2575_s19 = scalar_lea.hbm %s3062_s2, 2048 }
  0x24   :  { %s41_s15 = sshll.u32 %s2629_s14, 4  ;;  %p2576_p2 = scmp.ne.s32.totalorder %s3062_s2, %s2575_s19  ;;  %s42_s15 = int_to_ptr.vmem [resolvable:$true] %s41_s15 }
  0x25   :  { %p2579_p3 = scmp.lt.u32.totalorder %s2575_s19, %s3062_s2 }
  0x27   :  { %p2581_p4 = pnand %p2579_p3, %p2576_p2 }
  0x29   :  { %2584 = shalt.err (!%p2581_p4)
}
  0x2a   :  { %s2585_s24 = scalar_lea.vmem %s42_s15, 2048  ;;  %p2590_p6 = scmp.lt.s32.totalorder %s42_s15, %s42_s15 }
  0x2b   :  { %p2586_p5 = scmp.ne.s32.totalorder %s42_s15, %s2585_s24  ;;  %p2591_p7 = scmp.lt.s32.totalorder %s2585_s24, %s2585_s24 }
  0x2d   :  { %p2592_p8 = por %p2591_p7, %p2590_p6 }
  0x2f   :  { %p2593_p9 = pnand %p2592_p8, %p2586_p5 }
  0x31   :  { %2596 = shalt.err (!%p2593_p9)
}
  0x32   :  { %47 = dma.hbm_to_vmem [thread:$0]  %s3062_s2, 2048, %s42_s15, [#allocation7], %s2627_s27, %s2627_s27, %s2628_s28  }
  0x33   :  { %2619 = dma.done.wait [#allocation4], 1024  }
  0x34   :  { %2620 = vsyncadd [#allocation4], 4294966272 }
  0x35   :  { %2621 = dma.done.wait [#allocation7], 4096  }
  0x36   :  { %2622 = vsyncadd [#allocation7], 4294963200  ;;  %v2630_v0 = vmov 0.0|0.0   ;;  %vm2631_vm0 = vmmov 0   ;;  %v2632_v1 = vmov 0.0   ;;  %v64_v2 = vld [vmem:[#allocation6] sm:$0xff] }
  0x37   :  { %2122 = vmatprep.subr.bf16.mxu0 %v2630_v0  ;;  %1594 = vmatprep.mubr.msk.f32.mxu0 %vm2631_vm0, %v2632_v1  ;;  %v65_v3 = vld [vmem:[#allocation6 + $0x8] sm:$0xff]  ;;  %v66_v4 = vld [vmem:[#allocation6 + $0x10] sm:$0xff]  ;;  %v67_v6 = vld [vmem:[#allocation6 + $0x18] sm:$0xff] }
  0x38   :  { %2146 = vmatprep.subr.bf16.mxu1 %v2630_v0  ;;  %1629 = vmatprep.mubr.msk.f32.mxu1 %vm2631_vm0, %v2632_v1  ;;  %v2717_v5 = vpack.c.bf16 %v65_v3, %v64_v2  ;;  %v2720_v7 = vpack.c.bf16 %v67_v6, %v66_v4  ;;  %v68_v8 = vld [vmem:[#allocation6 + $0x20] sm:$0xff]  ;;  %v69_v9 = vld [vmem:[#allocation6 + $0x28] sm:$0xff]  ;;  %v82_v13 = vld [vmem:[#allocation8 + $0x10] sm:$0xff] }
  0x39   :  { %v80_v10 = vld [vmem:[#allocation8] sm:$0xff]  ;;  %v81_v11 = vld [vmem:[#allocation8 + $0x8] sm:$0xff]  ;;  %v83_v14 = vld [vmem:[#allocation8 + $0x18] sm:$0xff]  ;;  %v2726_v15 = vpack.c.bf16 %v69_v9, %v68_v8 }
  0x3a   :  { %2124 = vmatpush3.bf16.msra.mxu0 %v2717_v5  ;;  %v2723_v12 = vpack.c.bf16 %v81_v11, %v80_v10  ;;  %v70_v16 = vld [vmem:[#allocation6 + $0x30] sm:$0xff]  ;;  %v71_v17 = vld [vmem:[#allocation6 + $0x38] sm:$0xff]  ;;  %v2730_v18 = vpack.c.bf16 %v83_v14, %v82_v13  ;;  %v84_v19 = vld [vmem:[#allocation8 + $0x20] sm:$0xff] }
  0x3b   :  { %2125 = vmatprep.subr.bf16.mxu0 %v2630_v0  ;;  %v85_v20 = vld [vmem:[#allocation8 + $0x28] sm:$0xff]  ;;  %v2734_v21 = vpack.c.bf16 %v71_v17, %v70_v16  ;;  %v72_v22 = vld [vmem:[#allocation6 + $0x40] sm:$0xff]  ;;  %v86_v25 = vld [vmem:[#allocation8 + $0x30] sm:$0xff] }
  0x3c   :  { %2148 = vmatpush3.bf16.msra.mxu1 %v2723_v12  ;;  %v73_v23 = vld [vmem:[#allocation6 + $0x48] sm:$0xff]  ;;  %v2738_v24 = vpack.c.bf16 %v85_v20, %v84_v19  ;;  %v87_v26 = vld [vmem:[#allocation8 + $0x38] sm:$0xff]  ;;  %v74_v28 = vld [vmem:[#allocation6 + $0x50] sm:$0xff] }
  0x3d   :  { %2149 = vmatprep.subr.bf16.mxu1 %v2630_v0  ;;  %v2742_v27 = vpack.c.bf16 %v73_v23, %v72_v22  ;;  %v75_v29 = vld [vmem:[#allocation6 + $0x58] sm:$0xff]  ;;  %v2746_v30 = vpack.c.bf16 %v87_v26, %v86_v25  ;;  %v88_v31 = vld [vmem:[#allocation8 + $0x40] sm:$0xff]  ;;  %v89_v32 = vld [vmem:[#allocation8 + $0x48] sm:$0xff] }
  0x3e   :  { %2127 = vmatpush3.bf16.msra.mxu0 %v2720_v7  ;;  %v2750_v33 = vpack.c.bf16 %v75_v29, %v74_v28  ;;  %v76_v34 = vld [vmem:[#allocation6 + $0x60] sm:$0xff]  ;;  %v77_v35 = vld [vmem:[#allocation6 + $0x68] sm:$0xff]  ;;  %v2754_v36 = vpack.c.bf16 %v89_v32, %v88_v31  ;;  %v78_v38 = vld [vmem:[#allocation6 + $0x70] sm:$0xff] }
  0x3f   :  { %2128 = vmatprep.subr.bf16.mxu0 %v2630_v0  ;;  %v2758_v37 = vpack.c.bf16 %v77_v35, %v76_v34  ;;  %v79_v39 = vld [vmem:[#allocation6 + $0x78] sm:$0xff]  ;;  %v90_v41 = vld [vmem:[#allocation8 + $0x50] sm:$0xff]  ;;  %v92_v44 = vld [vmem:[#allocation8 + $0x60] sm:$0xff] }
  0x40   :  { %2151 = vmatpush3.bf16.msra.mxu1 %v2730_v18  ;;  %v2764_v40 = vpack.c.bf16 %v79_v39, %v78_v38  ;;  %v91_v42 = vld [vmem:[#allocation8 + $0x58] sm:$0xff]  ;;  %v93_v45 = vld [vmem:[#allocation8 + $0x68] sm:$0xff]  ;;  %v94_v47 = vld [vmem:[#allocation8 + $0x70] sm:$0xff] }
  0x41   :  { %2152 = vmatprep.subr.bf16.mxu1 %v2630_v0  ;;  %v2788_v43 = vpack.c.bf16 %v91_v42, %v90_v41  ;;  %v2792_v46 = vpack.c.bf16 %v93_v45, %v92_v44  ;;  %v95_v48 = vld [vmem:[#allocation8 + $0x78] sm:$0xff]  ;;  %v104_v50 = vld [vmem:[#allocation3] sm:$0xff]  ;;  %v249_v56 = vld [vmem:[#allocation3 + $0x8] sm:$0xff] }
  0x42   :  { %2130 = vmatpush3.bf16.msra.mxu0 %v2726_v15  ;;  %v2795_v49 = vpack.c.bf16 %v95_v48, %v94_v47  ;;  %v2839_v55 = vld [vmem:[%s3063_s3] ss:$0 sm:$0xff]  ;;  %v395_v2 = vld [vmem:[#allocation3 + $0x10] sm:$0xff]  ;;  %v541_v13 = vld [vmem:[#allocation3 + $0x18] sm:$0xff]  ;;  %s2633_s3 = smov [#allocation9]  }
  0x43   :  { %2131 = vmatprep.subr.bf16.mxu0 %v2630_v0  ;;  %v687_v25 = vld [vmem:[#allocation3 + $0x20] sm:$0xff]  ;;  %v833_v38 = vld [vmem:[#allocation3 + $0x28] sm:$0xff]  ;;  %s1276_s26 = sshll.u32 %s2633_s3, 4  ;;  %s1277_s26 = int_to_ptr.vmem [resolvable:$true] %s1276_s26 }
  0x44   :  { %2154 = vmatpush3.bf16.msra.mxu1 %v2738_v24  ;;  %s2597_s29 = scalar_lea.vmem %s1277_s26, 1024  ;;  %p2602_p11 = scmp.lt.s32.totalorder %s1277_s26, %s1277_s26 }
  0x45   :  { %2155 = vmatprep.subr.bf16.mxu1 %v2630_v0  ;;  %p2598_p10 = scmp.ne.s32.totalorder %s1277_s26, %s2597_s29  ;;  %p2603_p12 = scmp.lt.s32.totalorder %s2597_s29, %s2597_s29 }
  0x46   :  { %2133 = vmatpush3.bf16.msra.mxu0 %v2734_v21 }
  0x47   :  { %2134 = vmatprep.subr.bf16.mxu0 %v2630_v0  ;;  %p2604_p13 = por %p2603_p12, %p2602_p11 }
  0x48   :  { %2157 = vmatpush3.bf16.msra.mxu1 %v2746_v30 }
  0x49   :  { %2158 = vmatprep.subr.bf16.mxu1 %v2630_v0  ;;  %p2605_p0 = pnand %p2604_p13, %p2598_p10 }
  0x4a   :  { %2136 = vmatpush3.bf16.msra.mxu0 %v2742_v27 }
  0x4b   :  { %2137 = vmatprep.subr.bf16.mxu0 %v2630_v0 }
  0x4c   :  { %2160 = vmatpush3.bf16.msra.mxu1 %v2754_v36 }
  0x4d   :  { %2161 = vmatprep.subr.bf16.mxu1 %v2630_v0 }
  0x4e   :  { %2139 = vmatpush3.bf16.msra.mxu0 %v2750_v33 }
  0x4f   :  { %2140 = vmatprep.subr.bf16.mxu0 %v2630_v0 }
  0x50   :  { %2163 = vmatpush3.bf16.msra.mxu1 %v2788_v43 }
  0x51   :  { %2164 = vmatprep.subr.bf16.mxu1 %v2630_v0 }
  0x52   :  { %2142 = vmatpush3.bf16.msra.mxu0 %v2758_v37 }
  0x53   :  { %2143 = vmatprep.subr.bf16.mxu0 %v2630_v0 }
  0x54   :  { %2166 = vmatpush3.bf16.msra.mxu1 %v2792_v46 }
  0x55   :  { %2167 = vmatprep.subr.bf16.mxu1 %v2630_v0 }
  0x56   :  { %2145 = vmatpush3.bf16.msra.mxu0 %v2764_v40 }
  0x57   :  { %2170 = vmatprep.subr.bf16.mxu0 %v2630_v0 }
  0x58   :  { %2169 = vmatpush3.bf16.msra.mxu1 %v2795_v49 }
  0x59   :  { %1595 = vmatmul.mubr.f32.vlgmr.msra.gmra.mrb[0].mxu0 %v2632_v1  ;;  %2194 = vmatprep.subr.bf16.mxu1 %v2630_v0 }
  0x5a   :  { %2172 = vmatpush3.bf16.msra.mxu0 %v2717_v5  ;;  %1664 = vmatprep.mubr.msk.f32.mxu0 %vm2631_vm0, %v2632_v1 }
  0x5b   :  { %2173 = vmatprep.subr.bf16.mxu0 %v2630_v0 }
  0x5e   :  { %2175 = vmatpush3.bf16.msra.mxu0 %v2720_v7 }
  0x5f   :  { %2176 = vmatprep.subr.bf16.mxu0 %v2630_v0 }
  0x62   :  { %2178 = vmatpush3.bf16.msra.mxu0 %v2726_v15 }
  0x63   :  { %2179 = vmatprep.subr.bf16.mxu0 %v2630_v0 }
  0x66   :  { %2181 = vmatpush3.bf16.msra.mxu0 %v2734_v21 }
  0x67   :  { %2182 = vmatprep.subr.bf16.mxu0 %v2630_v0 }
  0x6a   :  { %2184 = vmatpush3.bf16.msra.mxu0 %v2742_v27 }
  0x6b   :  { %2185 = vmatprep.subr.bf16.mxu0 %v2630_v0 }
  0x6e   :  { %2187 = vmatpush3.bf16.msra.mxu0 %v2750_v33 }
  0x6f   :  { %2188 = vmatprep.subr.bf16.mxu0 %v2630_v0 }
  0x72   :  { %2190 = vmatpush3.bf16.msra.mxu0 %v2758_v37 }
  0x73   :  { %2191 = vmatprep.subr.bf16.mxu0 %v2630_v0 }
  0x76   :  { %2193 = vmatpush3.bf16.msra.mxu0 %v2764_v40 }
  0x77   :  { %2218 = vmatprep.subr.bf16.mxu0 %v2630_v0 }
 0x12c   :  { %v171_v51 = vpop.f32.mrb[0].mxu0 }
 0x12d   :  { %v175_v52 = vadd.f32 %v171_v51, %v104_v50  ;;  %v1596_v53 = vpop.f32.mrb[1].mxu0 }
 0x12f   :  { %2515 = vtanh.f32 %v175_v52 }
 0x139   :  { %v2516_v54 = vpop.eup %2515 }
 0x13a   :  { %1630 = vmatmul.mubr.f32.vlgmr.msra.gmra.mrb[0].mxu1 %v2516_v54  ;;  %1665 = vmatmul.mubr.f32.vlgmr.msra.gmra.mrb[2].mxu0 %v2516_v54 }
 0x13b   :  { %2196 = vmatpush3.bf16.msra.mxu1 %v2723_v12  ;;  %2220 = vmatpush3.bf16.msra.mxu0 %v2717_v5 }
 0x13c   :  { %2197 = vmatprep.subr.bf16.mxu1 %v2630_v0  ;;  %2221 = vmatprep.subr.bf16.mxu0 %v2630_v0 }
 0x13d   :  { %1699 = vmatprep.mubr.msk.f32.mxu1 %vm2631_vm0, %v2632_v1  ;;  %1734 = vmatprep.mubr.msk.f32.mxu0 %vm2631_vm0, %v2632_v1 }
 0x13f   :  { %2199 = vmatpush3.bf16.msra.mxu1 %v2730_v18  ;;  %2223 = vmatpush3.bf16.msra.mxu0 %v2720_v7 }
 0x140   :  { %2200 = vmatprep.subr.bf16.mxu1 %v2630_v0  ;;  %2224 = vmatprep.subr.bf16.mxu0 %v2630_v0 }
 0x143   :  { %2202 = vmatpush3.bf16.msra.mxu1 %v2738_v24  ;;  %2226 = vmatpush3.bf16.msra.mxu0 %v2726_v15 }
 0x144   :  { %2203 = vmatprep.subr.bf16.mxu1 %v2630_v0  ;;  %2227 = vmatprep.subr.bf16.mxu0 %v2630_v0 }
 0x147   :  { %2205 = vmatpush3.bf16.msra.mxu1 %v2746_v30  ;;  %2229 = vmatpush3.bf16.msra.mxu0 %v2734_v21 }
 0x148   :  { %2206 = vmatprep.subr.bf16.mxu1 %v2630_v0  ;;  %2230 = vmatprep.subr.bf16.mxu0 %v2630_v0 }
 0x14b   :  { %2208 = vmatpush3.bf16.msra.mxu1 %v2754_v36  ;;  %2232 = vmatpush3.bf16.msra.mxu0 %v2742_v27 }
 0x14c   :  { %2209 = vmatprep.subr.bf16.mxu1 %v2630_v0  ;;  %2233 = vmatprep.subr.bf16.mxu0 %v2630_v0 }
 0x14f   :  { %2211 = vmatpush3.bf16.msra.mxu1 %v2788_v43  ;;  %2235 = vmatpush3.bf16.msra.mxu0 %v2750_v33 }
 0x150   :  { %2212 = vmatprep.subr.bf16.mxu1 %v2630_v0  ;;  %2236 = vmatprep.subr.bf16.mxu0 %v2630_v0 }
 0x153   :  { %2214 = vmatpush3.bf16.msra.mxu1 %v2792_v46  ;;  %2238 = vmatpush3.bf16.msra.mxu0 %v2758_v37 }
 0x154   :  { %2215 = vmatprep.subr.bf16.mxu1 %v2630_v0  ;;  %2239 = vmatprep.subr.bf16.mxu0 %v2630_v0 }
 0x157   :  { %2217 = vmatpush3.bf16.msra.mxu1 %v2795_v49  ;;  %2241 = vmatpush3.bf16.msra.mxu0 %v2764_v40 }
 0x158   :  { %2242 = vmatprep.subr.bf16.mxu1 %v2630_v0  ;;  %2266 = vmatprep.subr.bf16.mxu0 %v2630_v0 }
 0x20d   :  { %v243_v57 = vpop.f32.mrb[0].mxu1  ;;  %v316_v58 = vpop.f32.mrb[2].mxu0 }
 0x20e   :  { %v244_v59 = vadd.f32 %v2839_v55, %v243_v57  ;;  %v320_v60 = vadd.f32 %v316_v58, %v249_v56  ;;  %v1631_v61 = vpop.f32.mrb[1].mxu1  ;;  %v1666_v62 = vpop.f32.mrb[3].mxu0 }
 0x210   :  { %247 = vst [vmem:[#allocation9] sm:$0xff] %v244_v59  ;;  %2517 = vtanh.f32 %v320_v60 }
 0x21a   :  { %v2518_v63 = vpop.eup %2517 }
 0x21b   :  { %1700 = vmatmul.mubr.f32.vlgmr.msra.gmra.mrb[2].mxu1 %v2518_v63  ;;  %1735 = vmatmul.mubr.f32.vlgmr.msra.gmra.mrb[4].mxu0 %v2518_v63 }
 0x21c   :  { %2244 = vmatpush3.bf16.msra.mxu1 %v2723_v12  ;;  %2268 = vmatpush3.bf16.msra.mxu0 %v2717_v5 }
 0x21d   :  { %2245 = vmatprep.subr.bf16.mxu1 %v2630_v0  ;;  %2269 = vmatprep.subr.bf16.mxu0 %v2630_v0 }
 0x21e   :  { %1769 = vmatprep.mubr.msk.f32.mxu1 %vm2631_vm0, %v2632_v1  ;;  %1804 = vmatprep.mubr.msk.f32.mxu0 %vm2631_vm0, %v2632_v1 }
 0x220   :  { %2247 = vmatpush3.bf16.msra.mxu1 %v2730_v18  ;;  %2271 = vmatpush3.bf16.msra.mxu0 %v2720_v7 }
 0x221   :  { %2248 = vmatprep.subr.bf16.mxu1 %v2630_v0  ;;  %2272 = vmatprep.subr.bf16.mxu0 %v2630_v0 }
 0x224   :  { %2250 = vmatpush3.bf16.msra.mxu1 %v2738_v24  ;;  %2274 = vmatpush3.bf16.msra.mxu0 %v2726_v15 }
 0x225   :  { %2251 = vmatprep.subr.bf16.mxu1 %v2630_v0  ;;  %2275 = vmatprep.subr.bf16.mxu0 %v2630_v0 }
 0x228   :  { %2253 = vmatpush3.bf16.msra.mxu1 %v2746_v30  ;;  %2277 = vmatpush3.bf16.msra.mxu0 %v2734_v21 }
 0x229   :  { %2254 = vmatprep.subr.bf16.mxu1 %v2630_v0  ;;  %2278 = vmatprep.subr.bf16.mxu0 %v2630_v0 }
 0x22c   :  { %2256 = vmatpush3.bf16.msra.mxu1 %v2754_v36  ;;  %2280 = vmatpush3.bf16.msra.mxu0 %v2742_v27 }
 0x22d   :  { %2257 = vmatprep.subr.bf16.mxu1 %v2630_v0  ;;  %2281 = vmatprep.subr.bf16.mxu0 %v2630_v0 }
 0x230   :  { %2259 = vmatpush3.bf16.msra.mxu1 %v2788_v43  ;;  %2283 = vmatpush3.bf16.msra.mxu0 %v2750_v33 }
 0x231   :  { %2260 = vmatprep.subr.bf16.mxu1 %v2630_v0  ;;  %2284 = vmatprep.subr.bf16.mxu0 %v2630_v0 }
 0x234   :  { %2262 = vmatpush3.bf16.msra.mxu1 %v2792_v46  ;;  %2286 = vmatpush3.bf16.msra.mxu0 %v2758_v37 }
 0x235   :  { %2263 = vmatprep.subr.bf16.mxu1 %v2630_v0  ;;  %2287 = vmatprep.subr.bf16.mxu0 %v2630_v0 }
 0x238   :  { %2265 = vmatpush3.bf16.msra.mxu1 %v2795_v49  ;;  %2289 = vmatpush3.bf16.msra.mxu0 %v2764_v40 }
 0x239   :  { %2290 = vmatprep.subr.bf16.mxu1 %v2630_v0  ;;  %2314 = vmatprep.subr.bf16.mxu0 %v2630_v0 }
 0x2ee   :  { %v388_v3 = vpop.f32.mrb[2].mxu1  ;;  %v462_v4 = vpop.f32.mrb[4].mxu0 }
 0x2ef   :  { %v389_v6 = vadd.f32 %v2839_v55, %v388_v3  ;;  %v466_v8 = vadd.f32 %v462_v4, %v395_v2  ;;  %v1701_v9 = vpop.f32.mrb[3].mxu1  ;;  %v1736_v10 = vpop.f32.mrb[5].mxu0 }
 0x2f1   :  { %393 = vst [vmem:[#allocation9 + $0x8] sm:$0xff] %v389_v6  ;;  %2519 = vtanh.f32 %v466_v8 }
 0x2fb   :  { %v2520_v11 = vpop.eup %2519 }
 0x2fc   :  { %1770 = vmatmul.mubr.f32.vlgmr.msra.gmra.mrb[4].mxu1 %v2520_v11  ;;  %1805 = vmatmul.mubr.f32.vlgmr.msra.gmra.mrb[6].mxu0 %v2520_v11 }
 0x2fd   :  { %2292 = vmatpush3.bf16.msra.mxu1 %v2723_v12  ;;  %2316 = vmatpush3.bf16.msra.mxu0 %v2717_v5 }
 0x2fe   :  { %2293 = vmatprep.subr.bf16.mxu1 %v2630_v0  ;;  %2317 = vmatprep.subr.bf16.mxu0 %v2630_v0 }
 0x2ff   :  { %1839 = vmatprep.mubr.msk.f32.mxu1 %vm2631_vm0, %v2632_v1  ;;  %1874 = vmatprep.mubr.msk.f32.mxu0 %vm2631_vm0, %v2632_v1 }
 0x301   :  { %2295 = vmatpush3.bf16.msra.mxu1 %v2730_v18  ;;  %2319 = vmatpush3.bf16.msra.mxu0 %v2720_v7 }
 0x302   :  { %2296 = vmatprep.subr.bf16.mxu1 %v2630_v0  ;;  %2320 = vmatprep.subr.bf16.mxu0 %v2630_v0 }
 0x305   :  { %2298 = vmatpush3.bf16.msra.mxu1 %v2738_v24  ;;  %2322 = vmatpush3.bf16.msra.mxu0 %v2726_v15 }
 0x306   :  { %2299 = vmatprep.subr.bf16.mxu1 %v2630_v0  ;;  %2323 = vmatprep.subr.bf16.mxu0 %v2630_v0 }
 0x309   :  { %2301 = vmatpush3.bf16.msra.mxu1 %v2746_v30  ;;  %2325 = vmatpush3.bf16.msra.mxu0 %v2734_v21 }
 0x30a   :  { %2302 = vmatprep.subr.bf16.mxu1 %v2630_v0  ;;  %2326 = vmatprep.subr.bf16.mxu0 %v2630_v0 }
 0x30d   :  { %2304 = vmatpush3.bf16.msra.mxu1 %v2754_v36  ;;  %2328 = vmatpush3.bf16.msra.mxu0 %v2742_v27 }
 0x30e   :  { %2305 = vmatprep.subr.bf16.mxu1 %v2630_v0  ;;  %2329 = vmatprep.subr.bf16.mxu0 %v2630_v0 }
 0x311   :  { %2307 = vmatpush3.bf16.msra.mxu1 %v2788_v43  ;;  %2331 = vmatpush3.bf16.msra.mxu0 %v2750_v33 }
 0x312   :  { %2308 = vmatprep.subr.bf16.mxu1 %v2630_v0  ;;  %2332 = vmatprep.subr.bf16.mxu0 %v2630_v0 }
 0x315   :  { %2310 = vmatpush3.bf16.msra.mxu1 %v2792_v46  ;;  %2334 = vmatpush3.bf16.msra.mxu0 %v2758_v37 }
 0x316   :  { %2311 = vmatprep.subr.bf16.mxu1 %v2630_v0  ;;  %2335 = vmatprep.subr.bf16.mxu0 %v2630_v0 }
 0x319   :  { %2313 = vmatpush3.bf16.msra.mxu1 %v2795_v49  ;;  %2337 = vmatpush3.bf16.msra.mxu0 %v2764_v40 }
 0x31a   :  { %2338 = vmatprep.subr.bf16.mxu1 %v2630_v0  ;;  %2362 = vmatprep.subr.bf16.mxu0 %v2630_v0 }
 0x3cf   :  { %v534_v14 = vpop.f32.mrb[4].mxu1  ;;  %v608_v16 = vpop.f32.mrb[6].mxu0 }
 0x3d0   :  { %v535_v17 = vadd.f32 %v2839_v55, %v534_v14  ;;  %v612_v19 = vadd.f32 %v608_v16, %v541_v13  ;;  %v1771_v20 = vpop.f32.mrb[5].mxu1  ;;  %v1806_v22 = vpop.f32.mrb[7].mxu0 }
 0x3d2   :  { %539 = vst [vmem:[#allocation9 + $0x10] sm:$0xff] %v535_v17  ;;  %2521 = vtanh.f32 %v612_v19 }
 0x3dc   :  { %v2522_v23 = vpop.eup %2521 }
 0x3dd   :  { %1840 = vmatmul.mubr.f32.vlgmr.msra.gmra.mrb[6].mxu1 %v2522_v23  ;;  %1875 = vmatmul.mubr.f32.vlgmr.msra.gmra.mrb[8].mxu0 %v2522_v23 }
 0x3de   :  { %2340 = vmatpush3.bf16.msra.mxu1 %v2723_v12  ;;  %2364 = vmatpush3.bf16.msra.mxu0 %v2717_v5 }
 0x3df   :  { %2341 = vmatprep.subr.bf16.mxu1 %v2630_v0  ;;  %2365 = vmatprep.subr.bf16.mxu0 %v2630_v0 }
 0x3e0   :  { %1909 = vmatprep.mubr.msk.f32.mxu1 %vm2631_vm0, %v2632_v1  ;;  %1944 = vmatprep.mubr.msk.f32.mxu0 %vm2631_vm0, %v2632_v1 }
 0x3e2   :  { %2343 = vmatpush3.bf16.msra.mxu1 %v2730_v18  ;;  %2367 = vmatpush3.bf16.msra.mxu0 %v2720_v7 }
 0x3e3   :  { %2344 = vmatprep.subr.bf16.mxu1 %v2630_v0  ;;  %2368 = vmatprep.subr.bf16.mxu0 %v2630_v0 }
 0x3e6   :  { %2346 = vmatpush3.bf16.msra.mxu1 %v2738_v24  ;;  %2370 = vmatpush3.bf16.msra.mxu0 %v2726_v15 }
 0x3e7   :  { %2347 = vmatprep.subr.bf16.mxu1 %v2630_v0  ;;  %2371 = vmatprep.subr.bf16.mxu0 %v2630_v0 }
 0x3ea   :  { %2349 = vmatpush3.bf16.msra.mxu1 %v2746_v30  ;;  %2373 = vmatpush3.bf16.msra.mxu0 %v2734_v21 }
 0x3eb   :  { %2350 = vmatprep.subr.bf16.mxu1 %v2630_v0  ;;  %2374 = vmatprep.subr.bf16.mxu0 %v2630_v0 }
 0x3ee   :  { %2352 = vmatpush3.bf16.msra.mxu1 %v2754_v36  ;;  %2376 = vmatpush3.bf16.msra.mxu0 %v2742_v27 }
 0x3ef   :  { %2353 = vmatprep.subr.bf16.mxu1 %v2630_v0  ;;  %2377 = vmatprep.subr.bf16.mxu0 %v2630_v0 }
 0x3f2   :  { %2355 = vmatpush3.bf16.msra.mxu1 %v2788_v43  ;;  %2379 = vmatpush3.bf16.msra.mxu0 %v2750_v33 }
 0x3f3   :  { %2356 = vmatprep.subr.bf16.mxu1 %v2630_v0  ;;  %2380 = vmatprep.subr.bf16.mxu0 %v2630_v0 }
 0x3f6   :  { %2358 = vmatpush3.bf16.msra.mxu1 %v2792_v46  ;;  %2382 = vmatpush3.bf16.msra.mxu0 %v2758_v37 }
 0x3f7   :  { %2359 = vmatprep.subr.bf16.mxu1 %v2630_v0  ;;  %2383 = vmatprep.subr.bf16.mxu0 %v2630_v0 }
 0x3fa   :  { %2361 = vmatpush3.bf16.msra.mxu1 %v2795_v49  ;;  %2385 = vmatpush3.bf16.msra.mxu0 %v2764_v40 }
 0x3fb   :  { %2386 = vmatprep.subr.bf16.mxu1 %v2630_v0  ;;  %2410 = vmatprep.subr.bf16.mxu0 %v2630_v0 }
 0x4b0   :  { %v680_v26 = vpop.f32.mrb[6].mxu1  ;;  %v754_v28 = vpop.f32.mrb[8].mxu0 }
 0x4b1   :  { %v681_v29 = vadd.f32 %v2839_v55, %v680_v26  ;;  %v758_v31 = vadd.f32 %v754_v28, %v687_v25  ;;  %v1841_v32 = vpop.f32.mrb[7].mxu1  ;;  %v1876_v34 = vpop.f32.mrb[9].mxu0 }
 0x4b3   :  { %685 = vst [vmem:[#allocation9 + $0x18] sm:$0xff] %v681_v29  ;;  %2523 = vtanh.f32 %v758_v31 }
 0x4bd   :  { %v2524_v35 = vpop.eup %2523 }
 0x4be   :  { %1910 = vmatmul.mubr.f32.vlgmr.msra.gmra.mrb[8].mxu1 %v2524_v35  ;;  %1945 = vmatmul.mubr.f32.vlgmr.msra.gmra.mrb[10].mxu0 %v2524_v35 }
 0x4bf   :  { %2388 = vmatpush3.bf16.msra.mxu1 %v2723_v12  ;;  %2412 = vmatpush3.bf16.msra.mxu0 %v2717_v5 }
 0x4c0   :  { %2389 = vmatprep.subr.bf16.mxu1 %v2630_v0  ;;  %2413 = vmatprep.subr.bf16.mxu0 %v2630_v0 }
 0x4c1   :  { %1979 = vmatprep.mubr.msk.f32.mxu1 %vm2631_vm0, %v2632_v1  ;;  %2014 = vmatprep.mubr.msk.f32.mxu0 %vm2631_vm0, %v2632_v1 }
 0x4c3   :  { %2391 = vmatpush3.bf16.msra.mxu1 %v2730_v18  ;;  %2415 = vmatpush3.bf16.msra.mxu0 %v2720_v7 }
 0x4c4   :  { %2392 = vmatprep.subr.bf16.mxu1 %v2630_v0  ;;  %2416 = vmatprep.subr.bf16.mxu0 %v2630_v0 }
 0x4c7   :  { %2394 = vmatpush3.bf16.msra.mxu1 %v2738_v24  ;;  %2418 = vmatpush3.bf16.msra.mxu0 %v2726_v15 }
 0x4c8   :  { %2395 = vmatprep.subr.bf16.mxu1 %v2630_v0  ;;  %2419 = vmatprep.subr.bf16.mxu0 %v2630_v0 }
 0x4cb   :  { %2397 = vmatpush3.bf16.msra.mxu1 %v2746_v30  ;;  %2421 = vmatpush3.bf16.msra.mxu0 %v2734_v21 }
 0x4cc   :  { %2398 = vmatprep.subr.bf16.mxu1 %v2630_v0  ;;  %2422 = vmatprep.subr.bf16.mxu0 %v2630_v0 }
 0x4cf   :  { %2400 = vmatpush3.bf16.msra.mxu1 %v2754_v36  ;;  %2424 = vmatpush3.bf16.msra.mxu0 %v2742_v27 }
 0x4d0   :  { %2401 = vmatprep.subr.bf16.mxu1 %v2630_v0  ;;  %2425 = vmatprep.subr.bf16.mxu0 %v2630_v0 }
 0x4d3   :  { %2403 = vmatpush3.bf16.msra.mxu1 %v2788_v43  ;;  %2427 = vmatpush3.bf16.msra.mxu0 %v2750_v33 }
 0x4d4   :  { %2404 = vmatprep.subr.bf16.mxu1 %v2630_v0  ;;  %2428 = vmatprep.subr.bf16.mxu0 %v2630_v0 }
 0x4d7   :  { %2406 = vmatpush3.bf16.msra.mxu1 %v2792_v46  ;;  %2430 = vmatpush3.bf16.msra.mxu0 %v2758_v37 }
 0x4d8   :  { %2407 = vmatprep.subr.bf16.mxu1 %v2630_v0  ;;  %2431 = vmatprep.subr.bf16.mxu0 %v2630_v0 }
 0x4db   :  { %2409 = vmatpush3.bf16.msra.mxu1 %v2795_v49  ;;  %2433 = vmatpush3.bf16.msra.mxu0 %v2764_v40 }
 0x4dc   :  { %2434 = vmatprep.subr.bf16.mxu1 %v2630_v0  ;;  %2458 = vmatprep.subr.bf16.mxu0 %v2630_v0 }
 0x591   :  { %v826_v39 = vpop.f32.mrb[8].mxu1  ;;  %v900_v41 = vpop.f32.mrb[10].mxu0 }
 0x592   :  { %v827_v42 = vadd.f32 %v2839_v55, %v826_v39  ;;  %v904_v44 = vadd.f32 %v900_v41, %v833_v38  ;;  %v1911_v45 = vpop.f32.mrb[9].mxu1  ;;  %v1946_v47 = vpop.f32.mrb[11].mxu0 }
 0x594   :  { %831 = vst [vmem:[#allocation9 + $0x20] sm:$0xff] %v827_v42  ;;  %2525 = vtanh.f32 %v904_v44 }
 0x59e   :  { %v2526_v48 = vpop.eup %2525 }
 0x59f   :  { %1980 = vmatmul.mubr.f32.vlgmr.msra.gmra.mrb[10].mxu1 %v2526_v48  ;;  %2015 = vmatmul.mubr.f32.vlgmr.msra.gmra.mrb[12].mxu0 %v2526_v48 }
 0x5a0   :  { %2436 = vmatpush3.bf16.msra.mxu1 %v2723_v12  ;;  %2460 = vmatpush3.bf16.msra.mxu0 %v2717_v5  ;;  %v979_v5 = vld [vmem:[#allocation3 + $0x30] sm:$0xff] }
 0x5a1   :  { %2437 = vmatprep.subr.bf16.mxu1 %v2630_v0  ;;  %2461 = vmatprep.subr.bf16.mxu0 %v2630_v0 }
 0x5a2   :  { %2049 = vmatprep.mubr.msk.f32.mxu1 %vm2631_vm0, %v2632_v1  ;;  %2084 = vmatprep.mubr.msk.f32.mxu0 %vm2631_vm0, %v2632_v1 }
 0x5a4   :  { %2439 = vmatpush3.bf16.msra.mxu1 %v2730_v18  ;;  %2463 = vmatpush3.bf16.msra.mxu0 %v2720_v7 }
 0x5a5   :  { %2440 = vmatprep.subr.bf16.mxu1 %v2630_v0  ;;  %2464 = vmatprep.subr.bf16.mxu0 %v2630_v0 }
 0x5a8   :  { %2442 = vmatpush3.bf16.msra.mxu1 %v2738_v24  ;;  %2466 = vmatpush3.bf16.msra.mxu0 %v2726_v15 }
 0x5a9   :  { %2443 = vmatprep.subr.bf16.mxu1 %v2630_v0  ;;  %2467 = vmatprep.subr.bf16.mxu0 %v2630_v0 }
 0x5ac   :  { %2445 = vmatpush3.bf16.msra.mxu1 %v2746_v30  ;;  %2469 = vmatpush3.bf16.msra.mxu0 %v2734_v21 }
 0x5ad   :  { %2446 = vmatprep.subr.bf16.mxu1 %v2630_v0  ;;  %2470 = vmatprep.subr.bf16.mxu0 %v2630_v0 }
 0x5b0   :  { %2448 = vmatpush3.bf16.msra.mxu1 %v2754_v36  ;;  %2472 = vmatpush3.bf16.msra.mxu0 %v2742_v27 }
 0x5b1   :  { %2449 = vmatprep.subr.bf16.mxu1 %v2630_v0  ;;  %2473 = vmatprep.subr.bf16.mxu0 %v2630_v0 }
 0x5b4   :  { %2451 = vmatpush3.bf16.msra.mxu1 %v2788_v43  ;;  %2475 = vmatpush3.bf16.msra.mxu0 %v2750_v33 }
 0x5b5   :  { %2452 = vmatprep.subr.bf16.mxu1 %v2630_v0  ;;  %2476 = vmatprep.subr.bf16.mxu0 %v2630_v0 }
 0x5b8   :  { %2454 = vmatpush3.bf16.msra.mxu1 %v2792_v46  ;;  %2478 = vmatpush3.bf16.msra.mxu0 %v2758_v37 }
 0x5b9   :  { %2455 = vmatprep.subr.bf16.mxu1 %v2630_v0  ;;  %2479 = vmatprep.subr.bf16.mxu0 %v2630_v0 }
 0x5bc   :  { %2457 = vmatpush3.bf16.msra.mxu1 %v2795_v49  ;;  %2481 = vmatpush3.bf16.msra.mxu0 %v2764_v40 }
 0x5bd   :  { %2482 = vmatprep.subr.bf16.mxu1 %v2630_v0 }
 0x672   :  { %v972_v7 = vpop.f32.mrb[10].mxu1  ;;  %v1046_v15 = vpop.f32.mrb[12].mxu0 }
 0x673   :  { %v973_v21 = vadd.f32 %v2839_v55, %v972_v7  ;;  %v1050_v27 = vadd.f32 %v1046_v15, %v979_v5  ;;  %v1981_v33 = vpop.f32.mrb[11].mxu1  ;;  %v2016_v50 = vpop.f32.mrb[13].mxu0 }
 0x675   :  { %977 = vst [vmem:[#allocation9 + $0x28] sm:$0xff] %v973_v21  ;;  %2527 = vtanh.f32 %v1050_v27 }
 0x67f   :  { %v2528_v37 = vpop.eup %2527 }
 0x680   :  { %2050 = vmatmul.mubr.f32.vlgmr.msra.gmra.mrb[12].mxu1 %v2528_v37  ;;  %2085 = vmatmul.mubr.f32.vlgmr.msra.gmra.mrb[14].mxu0 %v2528_v37 }
 0x681   :  { %2484 = vmatpush3.bf16.msra.mxu1 %v2723_v12  ;;  %2119 = vmatprep.mubr.msk.f32.mxu1 %vm2631_vm0, %v2632_v1  ;;  %v1125_v1 = vld [vmem:[#allocation3 + $0x38] sm:$0xff] }
 0x682   :  { %2485 = vmatprep.subr.bf16.mxu1 %v2630_v0 }
 0x685   :  { %2487 = vmatpush3.bf16.msra.mxu1 %v2730_v18 }
 0x686   :  { %2488 = vmatprep.subr.bf16.mxu1 %v2630_v0 }
 0x689   :  { %2490 = vmatpush3.bf16.msra.mxu1 %v2738_v24 }
 0x68a   :  { %2491 = vmatprep.subr.bf16.mxu1 %v2630_v0 }
 0x68d   :  { %2493 = vmatpush3.bf16.msra.mxu1 %v2746_v30 }
 0x68e   :  { %2494 = vmatprep.subr.bf16.mxu1 %v2630_v0 }
 0x691   :  { %2496 = vmatpush3.bf16.msra.mxu1 %v2754_v36 }
 0x692   :  { %2497 = vmatprep.subr.bf16.mxu1 %v2630_v0 }
 0x695   :  { %2499 = vmatpush3.bf16.msra.mxu1 %v2788_v43 }
 0x696   :  { %2500 = vmatprep.subr.bf16.mxu1 %v2630_v0 }
 0x699   :  { %2502 = vmatpush3.bf16.msra.mxu1 %v2792_v46 }
 0x69a   :  { %2503 = vmatprep.subr.bf16.mxu1 %v2630_v0 }
 0x69d   :  { %2505 = vmatpush3.bf16.msra.mxu1 %v2795_v49 }
 0x753   :  { %v1118_v12 = vpop.f32.mrb[12].mxu1  ;;  %v1192_v18 = vpop.f32.mrb[14].mxu0 }
 0x754   :  { %v1119_v24 = vadd.f32 %v2839_v55, %v1118_v12  ;;  %v1196_v30 = vadd.f32 %v1192_v18, %v1125_v1  ;;  %v2051_v40 = vpop.f32.mrb[13].mxu1  ;;  %v2086_v36 = vpop.f32.mrb[15].mxu0 }
 0x756   :  { %1123 = vst [vmem:[#allocation9 + $0x30] sm:$0xff] %v1119_v24  ;;  %2529 = vtanh.f32 %v1196_v30 }
 0x760   :  { %v2530_v51 = vpop.eup %2529 }
 0x761   :  { %2120 = vmatmul.mubr.f32.vlgmr.msra.gmra.mrb[14].mxu1 %v2530_v51 }
 0x834   :  { %v1264_v43 = vpop.f32.mrb[14].mxu1 }
 0x835   :  { %v1265_v46 = vadd.f32 %v2839_v55, %v1264_v43  ;;  %v2121_v0 = vpop.f32.mrb[15].mxu1 }
 0x837   :  { %1269 = vst [vmem:[#allocation9 + $0x38] sm:$0xff] %v1265_v46 }
 0x838   :  { %2608 = shalt.err (!%p2605_p0)
}
 0x839   :  { %s2609_s6 = scalar_lea.hbm %s3064_s4, 1024 }
 0x83a   :  { %p2610_p1 = scmp.ne.s32.totalorder %s3064_s4, %s2609_s6  ;;  %p2613_p2 = scmp.lt.u32.totalorder %s2609_s6, %s3064_s4 }
 0x83c   :  { %p2615_p3 = pnand %p2613_p2, %p2610_p1 }
 0x83e   :  { %2618 = shalt.err (!%p2615_p3)
}
 0x83f   :  { %1282 = dma.vmem_to_hbm [thread:$0]  %s1277_s26, 1024, %s3064_s4, [#allocation5], %s2627_s27, %s2627_s27, %s2628_s28  }
 0x840   :  { %2623 = dma.done.wait [#allocation5], 1024  }
 0x841   :  { %2624 = vsyncadd [#allocation5], 4294966272 }
 0x842   :  { %1286 = vsyncpa [#allocation4], 1 }
 0x843   :  { %1287 = vsyncpa [#allocation7], 1 }
 0x844   :  { %1288 = vsyncpa [#allocation5], 1 }

</bundles_post_ra>
